<compile_context>
chip_gen: v7x
topology: tpu7x:2x2x1
jax: 0.10.0
libtpu: 0.0.40
codegen_flags: <defaults>
</compile_context>

<pallas_src>
import jax
import jax.numpy as jnp
from jax.experimental import pallas as pl
from jax.experimental.pallas import tpu as pltpu

HID = 100        # logical hidden width (PyTorch module)
HID_PAD = 128    # lane-aligned hidden width used inside the kernel
LANE = 128
SUBLANE = 8


def _round_up(x, m):
    return ((x + m - 1) // m) * m


# ----------------------------------------------------------------------------
# Kernel: one TILE_B-row block of the batch through the whole 4-layer MLP.
# All activations stay in vregs; only x / params / out touch HBM.
# ----------------------------------------------------------------------------
def critic_kernel(x_ref,
                  w1_ref, b1_ref,
                  w2_ref, b2_ref,
                  w3_ref, b3_ref,
                  w4_ref, b4_ref,
                  o_ref):
    x = x_ref[...]

    h = jnp.dot(x, w1_ref[...], preferred_element_type=jnp.float32) + b1_ref[...]
    h = jnp.maximum(h, 0.0)

    h = jnp.dot(h, w2_ref[...], preferred_element_type=jnp.float32) + b2_ref[...]
    h = jnp.maximum(h, 0.0)

    h = jnp.dot(h, w3_ref[...], preferred_element_type=jnp.float32) + b3_ref[...]
    h = jnp.maximum(h, 0.0)

    out = jnp.dot(h, w4_ref[...], preferred_element_type=jnp.float32) + b4_ref[...]
    o_ref[...] = out.astype(o_ref.dtype)


# ----------------------------------------------------------------------------
# Wrapper
# ----------------------------------------------------------------------------
def critic_forward(x, padded_params, output_size, *, tile_b=None):
    """x: [B, input_size] float32.  padded_params: lane-padded weights/biases.

    Returns [B, output_size] float32 (padding rows/cols sliced off).
    """
    B, in_size = x.shape
    out_pad = padded_params["w4"].shape[1]

    # Batch tile: 256 rows feeds the 2x256 MXU on v6e/v7x; for tiny batches
    # use one sublane-aligned block so the grid is a single step.
    if tile_b is None:
        tile_b = min(256, _round_up(max(B, 1), SUBLANE))
    tile_b = _round_up(tile_b, SUBLANE)

    b_pad = _round_up(B, tile_b)
    if b_pad != B:
        x = jnp.pad(x, ((0, b_pad - B), (0, 0)))

    grid = (b_pad // tile_b,)

    def batch_map(i):
        return (i, 0)

    def resident_map(i):          # same block every step -> stays in VMEM
        return (0, 0)

    p = padded_params
    in_specs = [
        pl.BlockSpec((tile_b, in_size), batch_map),
        pl.BlockSpec(p["w1"].shape, resident_map),
        pl.BlockSpec(p["b1"].shape, resident_map),
        pl.BlockSpec(p["w2"].shape, resident_map),
        pl.BlockSpec(p["b2"].shape, resident_map),
        pl.BlockSpec(p["w3"].shape, resident_map),
        pl.BlockSpec(p["b3"].shape, resident_map),
        pl.BlockSpec(p["w4"].shape, resident_map),
        pl.BlockSpec(p["b4"].shape, resident_map),
    ]
    out_specs = pl.BlockSpec((tile_b, out_pad), batch_map)

    # Advisory cost: 4 matmuls (hidden padded to 128) over the padded batch.
    flops = 2 * b_pad * (in_size * HID_PAD + 2 * HID_PAD * HID_PAD + HID_PAD * out_pad)
    param_bytes = sum(int(v.size) for v in p.values()) * 4
    bytes_accessed = int(x.size) * 4 + param_bytes + b_pad * out_pad * 4
    cost = pl.CostEstimate(flops=flops, transcendentals=0,
                           bytes_accessed=bytes_accessed)

    out = pl.pallas_call(
        critic_kernel,
        out_shape=jax.ShapeDtypeStruct((b_pad, out_pad), jnp.float32),
        grid=grid,
        in_specs=in_specs,
        out_specs=out_specs,
        compiler_params=pltpu.CompilerParams(
            dimension_semantics=("parallel",),
            vmem_limit_bytes=32 * 1024 * 1024,   # safe on v7x's 64 MiB VMEM
        ),
        cost_estimate=cost,
    )(x,
      p["w1"], p["b1"],
      p["w2"], p["b2"],
      p["w3"], p["b3"],
      p["w4"], p["b4"])

    return out[:B, :output_size]


# ----------------------------------------------------------------------------
# Params (logical, PyTorch-like shapes) + lane padding for the kernel
# ----------------------------------------------------------------------------
def init_critic_params(key, input_size, output_size, hidden=HID):
    """Deterministic init mimicking nn.Linear (uniform +/- 1/sqrt(fan_in))."""
    dims = [(input_size, hidden), (hidden, hidden), (hidden, hidden),
            (hidden, output_size)]
    params = {}
    keys = jax.random.split(key, 2 * len(dims))
    for i, (fan_in, fan_out) in enumerate(dims):
        bound = 1.0 / jnp.sqrt(jnp.float32(fan_in))
        w = jax.random.uniform(keys[2 * i], (fan_in, fan_out),
                               minval=-bound, maxval=bound, dtype=jnp.float32)
        b = jax.random.uniform(keys[2 * i + 1], (1, fan_out),
                               minval=-bound, maxval=bound, dtype=jnp.float32)
        params[f"w{i + 1}"] = w
        params[f"b{i + 1}"] = b
    return params


def pad_params(params, output_size):
    """Zero-pad hidden 100->128 and output -> multiple of 128.

    Zero padding is exact: padded columns get bias 0, stay 0 through ReLU, and
    padded rows of the next weight multiply zero activations.
    """
    out_pad = _round_up(output_size, LANE)
    dh = HID_PAD - HID
    do = out_pad - output_size
    return {
        "w1": jnp.pad(params["w1"], ((0, 0), (0, dh))),
        "b1": jnp.pad(params["b1"], ((0, 0), (0, dh))),
        "w2": jnp.pad(params["w2"], ((0, dh), (0, dh))),
        "b2": jnp.pad(params["b2"], ((0, 0), (0, dh))),
        "w3": jnp.pad(params["w3"], ((0, dh), (0, dh))),
        "b3": jnp.pad(params["b3"], ((0, 0), (0, dh))),
        "w4": jnp.pad(params["w4"], ((0, dh), (0, do))),
        "b4": jnp.pad(params["b4"], ((0, 0), (0, do))),
    }


def critic_reference(x, params):
    """Pure-JAX reference (logical, unpadded params)."""
    h = jnp.maximum(x @ params["w1"] + params["b1"], 0.0)
    h = jnp.maximum(h @ params["w2"] + params["b2"], 0.0)
    h = jnp.maximum(h @ params["w3"] + params["b3"], 0.0)
    return h @ params["w4"] + params["b4"]


# TODO(synk): SAC's twin Q-networks could be fused into one call (stack weights
# along the output axis) to further amortize launch/DMA overhead; this script
# implements the single Critic module as specified.

if __name__ == "__main__":
    key = jax.random.PRNGKey(0)
    k_params, k_x, k_x2 = jax.random.split(key, 3)

    input_size = 16   # e.g. state_dim + action_dim
    output_size = 4

    params = init_critic_params(k_params, input_size, output_size)
    padded = pad_params(params, output_size)

    # Case 1: small sublane-aligned batch (single grid step).
    batch = 8
    x = jax.random.normal(k_x, (batch, input_size), dtype=jnp.float32)
    out = jax.block_until_ready(critic_forward(x, padded, output_size))
    ref = critic_reference(x, params)
    assert out.shape == (batch, output_size)
    assert jnp.allclose(out, ref, atol=1e-5, rtol=1e-5), "mismatch (B=8)"

    # Case 2: awkward batch size (exercises batch padding).
    batch2 = 37
    x2 = jax.random.normal(k_x2, (batch2, input_size), dtype=jnp.float32)
    out2 = jax.block_until_ready(critic_forward(x2, padded, output_size))
    ref2 = critic_reference(x2, params)
    assert out2.shape == (batch2, output_size)
    assert jnp.allclose(out2, ref2, atol=1e-5, rtol=1e-5), "mismatch (B=37)"

    # Case 3: multi-step grid (batch > tile) to exercise BlockSpec pipelining
    # and resident weights across steps.
    batch3 = 520
    x3 = jax.random.normal(jax.random.PRNGKey(7), (batch3, input_size),
                           dtype=jnp.float32)
    out3 = jax.block_until_ready(
        critic_forward(x3, padded, output_size, tile_b=256))
    ref3 = critic_reference(x3, params)
    assert out3.shape == (batch3, output_size)
    assert jnp.allclose(out3, ref3, atol=1e-5, rtol=1e-5), "mismatch (B=520)"

    print("KERNEL_OK")
</pallas_src>

<mosaic_0001>
module attributes {stable_mosaic.version = 11 : i64} {
  func.func @critic_kernel(%arg0: i32, %arg1: memref<8x16xf32, #tpu.memory_space<vmem>>, %arg2: memref<16x128xf32, #tpu.memory_space<vmem>>, %arg3: memref<1x128xf32, #tpu.memory_space<vmem>>, %arg4: memref<128x128xf32, #tpu.memory_space<vmem>>, %arg5: memref<1x128xf32, #tpu.memory_space<vmem>>, %arg6: memref<128x128xf32, #tpu.memory_space<vmem>>, %arg7: memref<1x128xf32, #tpu.memory_space<vmem>>, %arg8: memref<128x128xf32, #tpu.memory_space<vmem>>, %arg9: memref<1x128xf32, #tpu.memory_space<vmem>>, %arg10: memref<8x128xf32, #tpu.memory_space<vmem>>) attributes {dimension_semantics = [#tpu.dimension_semantics<parallel>], iteration_bounds = array<i64: 1>, scalar_prefetch = 0 : i64, scratch_operands = 0 : i64, tpu.core_type = #tpu.core_type<tc>, window_params = [{transform_indices = @transform_0, window_bounds = array<i64: 8, 16>}, {pipeline_mode = #tpu.pipeline_mode<synchronous>, transform_indices = @transform_1, window_bounds = array<i64: 16, 128>}, {pipeline_mode = #tpu.pipeline_mode<synchronous>, transform_indices = @transform_2, window_bounds = array<i64: 1, 128>}, {pipeline_mode = #tpu.pipeline_mode<synchronous>, transform_indices = @transform_3, window_bounds = array<i64: 128, 128>}, {pipeline_mode = #tpu.pipeline_mode<synchronous>, transform_indices = @transform_4, window_bounds = array<i64: 1, 128>}, {pipeline_mode = #tpu.pipeline_mode<synchronous>, transform_indices = @transform_5, window_bounds = array<i64: 128, 128>}, {pipeline_mode = #tpu.pipeline_mode<synchronous>, transform_indices = @transform_6, window_bounds = array<i64: 1, 128>}, {pipeline_mode = #tpu.pipeline_mode<synchronous>, transform_indices = @transform_7, window_bounds = array<i64: 128, 128>}, {pipeline_mode = #tpu.pipeline_mode<synchronous>, transform_indices = @transform_8, window_bounds = array<i64: 1, 128>}, {transform_indices = @transform_9, window_bounds = array<i64: 8, 128>}]} {
    %c0 = arith.constant 0 : index
    %c0_0 = arith.constant 0 : index
    %0 = vector.load %arg1[%c0, %c0_0] : memref<8x16xf32, #tpu.memory_space<vmem>>, vector<8x16xf32>
    %c0_1 = arith.constant 0 : index
    %c0_2 = arith.constant 0 : index
    %1 = vector.load %arg2[%c0_1, %c0_2] : memref<16x128xf32, #tpu.memory_space<vmem>>, vector<16x128xf32>
    %cst = arith.constant dense<0.000000e+00> : vector<8x128xf32>
    %2 = tpu.matmul %0, %1, %cst {dimension_numbers = #tpu.dot_dimension_numbers<[1], [0], [0], [1], [0, 0, 1, 1], [], []>} : vector<8x16xf32>, vector<16x128xf32>, vector<8x128xf32> -> vector<8x128xf32>
    %c0_3 = arith.constant 0 : index
    %c0_4 = arith.constant 0 : index
    %3 = vector.load %arg3[%c0_3, %c0_4] : memref<1x128xf32, #tpu.memory_space<vmem>>, vector<1x128xf32>
    %4 = vector.broadcast %3 : vector<1x128xf32> to vector<8x128xf32>
    %5 = arith.addf %2, %4 : vector<8x128xf32>
    %cst_5 = arith.constant 0.000000e+00 : f32
    %6 = vector.broadcast %cst_5 : f32 to vector<8x128xf32>
    %7 = arith.maximumf %5, %6 : vector<8x128xf32>
    %c0_6 = arith.constant 0 : index
    %c0_7 = arith.constant 0 : index
    %8 = vector.load %arg4[%c0_6, %c0_7] : memref<128x128xf32, #tpu.memory_space<vmem>>, vector<128x128xf32>
    %cst_8 = arith.constant dense<0.000000e+00> : vector<8x128xf32>
    %9 = tpu.matmul %7, %8, %cst_8 {dimension_numbers = #tpu.dot_dimension_numbers<[1], [0], [0], [1], [0, 0, 1, 1], [], []>} : vector<8x128xf32>, vector<128x128xf32>, vector<8x128xf32> -> vector<8x128xf32>
    %c0_9 = arith.constant 0 : index
    %c0_10 = arith.constant 0 : index
    %10 = vector.load %arg5[%c0_9, %c0_10] : memref<1x128xf32, #tpu.memory_space<vmem>>, vector<1x128xf32>
    %11 = vector.broadcast %10 : vector<1x128xf32> to vector<8x128xf32>
    %12 = arith.addf %9, %11 : vector<8x128xf32>
    %cst_11 = arith.constant 0.000000e+00 : f32
    %13 = vector.broadcast %cst_11 : f32 to vector<8x128xf32>
    %14 = arith.maximumf %12, %13 : vector<8x128xf32>
    %c0_12 = arith.constant 0 : index
    %c0_13 = arith.constant 0 : index
    %15 = vector.load %arg6[%c0_12, %c0_13] : memref<128x128xf32, #tpu.memory_space<vmem>>, vector<128x128xf32>
    %cst_14 = arith.constant dense<0.000000e+00> : vector<8x128xf32>
    %16 = tpu.matmul %14, %15, %cst_14 {dimension_numbers = #tpu.dot_dimension_numbers<[1], [0], [0], [1], [0, 0, 1, 1], [], []>} : vector<8x128xf32>, vector<128x128xf32>, vector<8x128xf32> -> vector<8x128xf32>
    %c0_15 = arith.constant 0 : index
    %c0_16 = arith.constant 0 : index
    %17 = vector.load %arg7[%c0_15, %c0_16] : memref<1x128xf32, #tpu.memory_space<vmem>>, vector<1x128xf32>
    %18 = vector.broadcast %17 : vector<1x128xf32> to vector<8x128xf32>
    %19 = arith.addf %16, %18 : vector<8x128xf32>
    %cst_17 = arith.constant 0.000000e+00 : f32
    %20 = vector.broadcast %cst_17 : f32 to vector<8x128xf32>
    %21 = arith.maximumf %19, %20 : vector<8x128xf32>
    %c0_18 = arith.constant 0 : index
    %c0_19 = arith.constant 0 : index
    %22 = vector.load %arg8[%c0_18, %c0_19] : memref<128x128xf32, #tpu.memory_space<vmem>>, vector<128x128xf32>
    %cst_20 = arith.constant dense<0.000000e+00> : vector<8x128xf32>
    %23 = tpu.matmul %21, %22, %cst_20 {dimension_numbers = #tpu.dot_dimension_numbers<[1], [0], [0], [1], [0, 0, 1, 1], [], []>} : vector<8x128xf32>, vector<128x128xf32>, vector<8x128xf32> -> vector<8x128xf32>
    %c0_21 = arith.constant 0 : index
    %c0_22 = arith.constant 0 : index
    %24 = vector.load %arg9[%c0_21, %c0_22] : memref<1x128xf32, #tpu.memory_space<vmem>>, vector<1x128xf32>
    %25 = vector.broadcast %24 : vector<1x128xf32> to vector<8x128xf32>
    %26 = arith.addf %23, %25 : vector<8x128xf32>
    %c0_23 = arith.constant 0 : index
    %c0_24 = arith.constant 0 : index
    %27 = vector.load %arg10[%c0_23, %c0_24] : memref<8x128xf32, #tpu.memory_space<vmem>>, vector<8x128xf32>
    tpu.vector_store %arg10[%c0_23, %c0_24], %26 {strides = array<i32>} : memref<8x128xf32, #tpu.memory_space<vmem>>, vector<8x128xf32>,
    return
  }
  func.func @transform_0(%arg0: i32) -> (i32, i32) {
    %c0_i32 = arith.constant 0 : i32
    %c0_i32_0 = arith.constant 0 : i32
    return %arg0, %c0_i32 : i32, i32
  }
  func.func @transform_1(%arg0: i32) -> (i32, i32) {
    %c0_i32 = arith.constant 0 : i32
    %c0_i32_0 = arith.constant 0 : i32
    %c0_i32_1 = arith.constant 0 : i32
    return %c0_i32, %c0_i32_0 : i32, i32
  }
  func.func @transform_2(%arg0: i32) -> (i32, i32) {
    %c0_i32 = arith.constant 0 : i32
    %c0_i32_0 = arith.constant 0 : i32
    %c0_i32_1 = arith.constant 0 : i32
    return %c0_i32, %c0_i32_0 : i32, i32
  }
  func.func @transform_3(%arg0: i32) -> (i32, i32) {
    %c0_i32 = arith.constant 0 : i32
    %c0_i32_0 = arith.constant 0 : i32
    %c0_i32_1 = arith.constant 0 : i32
    return %c0_i32, %c0_i32_0 : i32, i32
  }
  func.func @transform_4(%arg0: i32) -> (i32, i32) {
    %c0_i32 = arith.constant 0 : i32
    %c0_i32_0 = arith.constant 0 : i32
    %c0_i32_1 = arith.constant 0 : i32
    return %c0_i32, %c0_i32_0 : i32, i32
  }
  func.func @transform_5(%arg0: i32) -> (i32, i32) {
    %c0_i32 = arith.constant 0 : i32
    %c0_i32_0 = arith.constant 0 : i32
    %c0_i32_1 = arith.constant 0 : i32
    return %c0_i32, %c0_i32_0 : i32, i32
  }
  func.func @transform_6(%arg0: i32) -> (i32, i32) {
    %c0_i32 = arith.constant 0 : i32
    %c0_i32_0 = arith.constant 0 : i32
    %c0_i32_1 = arith.constant 0 : i32
    return %c0_i32, %c0_i32_0 : i32, i32
  }
  func.func @transform_7(%arg0: i32) -> (i32, i32) {
    %c0_i32 = arith.constant 0 : i32
    %c0_i32_0 = arith.constant 0 : i32
    %c0_i32_1 = arith.constant 0 : i32
    return %c0_i32, %c0_i32_0 : i32, i32
  }
  func.func @transform_8(%arg0: i32) -> (i32, i32) {
    %c0_i32 = arith.constant 0 : i32
    %c0_i32_0 = arith.constant 0 : i32
    %c0_i32_1 = arith.constant 0 : i32
    return %c0_i32, %c0_i32_0 : i32, i32
  }
  func.func @transform_9(%arg0: i32) -> (i32, i32) {
    %c0_i32 = arith.constant 0 : i32
    %c0_i32_0 = arith.constant 0 : i32
    return %arg0, %c0_i32 : i32, i32
  }
}

</mosaic_0001>

<bundles_post_ra>
// kernel: tpu_custom_call.1
= control target key start
LH: loop header
LB: loop body
LE: loop exit
PB: predicated region body
PF: predicated region fallthrough
CT: control target
= control target key end

     0   :  { %14 = vsyncpa [#allocation3], 0  ;;  %s1070_s0 = inlined_call_operand.hbm [shape: f32[8,16], index: 0, kind: input, shape index: {}]   ;;  %s1071_s1 = inlined_call_operand.hbm [shape: f32[16,128], index: 1, kind: input, shape index: {}]   ;;  %s1072_s2 = inlined_call_operand.vmem [shape: f32[1,128], index: 2, kind: input, shape index: {}]   ;;  %s1073_s3 = inlined_call_operand.hbm [shape: f32[128,128], index: 3, kind: input, shape index: {}]   ;;  %s1074_s4 = inlined_call_operand.vmem [shape: f32[1,128], index: 4, kind: input, shape index: {}]   ;;  %s1075_s5 = inlined_call_operand.hbm [shape: f32[128,128], index: 5, kind: input, shape index: {}]   ;;  %s1076_s6 = inlined_call_operand.vmem [shape: f32[1,128], index: 6, kind: input, shape index: {}]   ;;  %s1077_s7 = inlined_call_operand.hbm [shape: f32[128,128], index: 7, kind: input, shape index: {}]   ;;  %s1078_s8 = inlined_call_operand.vmem [shape: f32[1,128], index: 8, kind: input, shape index: {}]   ;;  %s1079_s9 = inlined_call_operand.hbm [shape: f32[8,128], index: 9, kind: output, shape index: {}]  }
   0x1   :  { %15 = vsyncpa [#allocation6], 0 }
   0x2   :  { %16 = vsyncpa [#allocation9], 0 }
   0x3   :  { %17 = vsyncpa [#allocation4], 0  ;;  %s880_s30 = smov [#allocation5]   ;;  %s740_s13 = scalar_lea.hbm %s1071_s1, 256 }
   0x4   :  { %s33_s10 = sshll.u32 %s880_s30, 4  ;;  %p741_p0 = scmp.ne.s32.totalorder %s1071_s1, %s740_s13  ;;  %s34_s10 = int_to_ptr.vmem [resolvable:$true] %s33_s10 }
   0x5   :  { %p744_p1 = scmp.lt.u32.totalorder %s740_s13, %s1071_s1 }
   0x7   :  { %p746_p2 = pnand %p744_p1, %p741_p0 }
   0x9   :  { %749 = shalt.err (!%p746_p2)
}
   0xa   :  { %s750_s18 = scalar_lea.vmem %s34_s10, 256  ;;  %p755_p4 = scmp.lt.s32.totalorder %s34_s10, %s34_s10 }
   0xb   :  { %p751_p3 = scmp.ne.s32.totalorder %s34_s10, %s750_s18  ;;  %p756_p5 = scmp.lt.s32.totalorder %s750_s18, %s750_s18 }
   0xd   :  { %p757_p6 = por %p756_p5, %p755_p4 }
   0xf   :  { %p758_p7 = pnand %p757_p6, %p751_p3 }
  0x11   :  { %761 = shalt.err (!%p758_p7)
}
  0x12   :  { %s881_s19 = smov 128   ;;  %s882_s20 = smov 8  }
  0x13   :  { %39 = dma.hbm_to_vmem [thread:$0]  %s1071_s1, 256, %s34_s10, [#allocation6], %s881_s19, %s881_s19, %s882_s20  }
  0x14   :  { %s883_s23 = smov [#allocation8]   ;;  %s884_s25 = smov [#allocation2]  }
  0x15   :  { %s61_s24 = sshll.u32 %s883_s23, 4  ;;  %s24_s26 = sshll.u32 %s884_s25, 4  ;;  %s62_s24 = int_to_ptr.vmem [resolvable:$true] %s61_s24  ;;  %s25_s26 = int_to_ptr.vmem [resolvable:$true] %s24_s26 }
  0x16   :  { %s762_s29 = scalar_lea.hbm %s1075_s5, 2048 }
  0x17   :  { %p763_p8 = scmp.ne.s32.totalorder %s1075_s5, %s762_s29  ;;  %p766_p9 = scmp.lt.u32.totalorder %s762_s29, %s1075_s5 }
  0x19   :  { %p768_p10 = pnand %p766_p9, %p763_p8 }
  0x1b   :  { %771 = shalt.err (!%p768_p10)
}
  0x1c   :  { %s772_s1 = scalar_lea.vmem %s62_s24, 2048  ;;  %p777_p12 = scmp.lt.s32.totalorder %s62_s24, %s62_s24 }
  0x1d   :  { %p773_p11 = scmp.ne.s32.totalorder %s62_s24, %s772_s1  ;;  %p778_p13 = scmp.lt.s32.totalorder %s772_s1, %s772_s1 }
  0x1f   :  { %p779_p0 = por %p778_p13, %p777_p12 }
  0x21   :  { %p780_p1 = pnand %p779_p0, %p773_p11 }
  0x23   :  { %783 = shalt.err (!%p780_p1)
}
  0x24   :  { %67 = dma.hbm_to_vmem [thread:$0]  %s1075_s5, 2048, %s62_s24, [#allocation9], %s881_s19, %s881_s19, %s882_s20  }
  0x25   :  { %s784_s17 = scalar_lea.hbm %s1070_s0, 128 }
  0x26   :  { %p785_p2 = scmp.ne.s32.totalorder %s1070_s0, %s784_s17  ;;  %p788_p3 = scmp.lt.u32.totalorder %s784_s17, %s1070_s0 }
  0x28   :  { %p790_p4 = pnand %p788_p3, %p785_p2 }
  0x2a   :  { %793 = shalt.err (!%p790_p4)
}
  0x2b   :  { %s794_s25 = scalar_lea.vmem %s25_s26, 128  ;;  %p799_p6 = scmp.lt.s32.totalorder %s25_s26, %s25_s26 }
  0x2c   :  { %p795_p5 = scmp.ne.s32.totalorder %s25_s26, %s794_s25  ;;  %p800_p7 = scmp.lt.s32.totalorder %s794_s25, %s794_s25 }
  0x2e   :  { %p801_p8 = por %p800_p7, %p799_p6 }
  0x30   :  { %p802_p9 = pnand %p801_p8, %p795_p5 }
  0x32   :  { %805 = shalt.err (!%p802_p9)
}
  0x33   :  { %27 = dma.hbm_to_vmem [thread:$0]  %s1070_s0, 128, %s25_s26, [#allocation3]  }
  0x34   :  { %s885_s27 = smov [#allocation7]   ;;  %s886_s29 = smov [#allocation10]  }
  0x35   :  { %s47_s28 = sshll.u32 %s885_s27, 4  ;;  %s75_s30 = sshll.u32 %s886_s29, 4  ;;  %s48_s28 = int_to_ptr.vmem [resolvable:$true] %s47_s28  ;;  %s76_s30 = int_to_ptr.vmem [resolvable:$true] %s75_s30 }
  0x36   :  { %s806_s13 = scalar_lea.hbm %s1073_s3, 2048 }
  0x37   :  { %p807_p10 = scmp.ne.s32.totalorder %s1073_s3, %s806_s13  ;;  %p810_p11 = scmp.lt.u32.totalorder %s806_s13, %s1073_s3 }
  0x39   :  { %p812_p12 = pnand %p810_p11, %p807_p10 }
  0x3b   :  { %815 = shalt.err (!%p812_p12)
}
  0x3c   :  { %s816_s0 = scalar_lea.vmem %s48_s28, 2048  ;;  %p821_p0 = scmp.lt.s32.totalorder %s48_s28, %s48_s28 }
  0x3d   :  { %p817_p13 = scmp.ne.s32.totalorder %s48_s28, %s816_s0  ;;  %p822_p1 = scmp.lt.s32.totalorder %s816_s0, %s816_s0 }
  0x3f   :  { %p823_p2 = por %p822_p1, %p821_p0 }
  0x41   :  { %p824_p3 = pnand %p823_p2, %p817_p13 }
  0x43   :  { %827 = shalt.err (!%p824_p3)
}
  0x44   :  { %53 = dma.hbm_to_vmem [thread:$0]  %s1073_s3, 2048, %s48_s28, [#allocation6], %s881_s19, %s881_s19, %s882_s20  }
  0x45   :  { %s828_s21 = scalar_lea.hbm %s1077_s7, 2048 }
  0x46   :  { %p829_p4 = scmp.ne.s32.totalorder %s1077_s7, %s828_s21  ;;  %p832_p5 = scmp.lt.u32.totalorder %s828_s21, %s1077_s7 }
  0x48   :  { %p834_p6 = pnand %p832_p5, %p829_p4 }
  0x4a   :  { %837 = shalt.err (!%p834_p6)
}
  0x4b   :  { %s838_s24 = scalar_lea.vmem %s76_s30, 2048  ;;  %p843_p8 = scmp.lt.s32.totalorder %s76_s30, %s76_s30 }
  0x4c   :  { %p839_p7 = scmp.ne.s32.totalorder %s76_s30, %s838_s24  ;;  %p844_p9 = scmp.lt.s32.totalorder %s838_s24, %s838_s24 }
  0x4e   :  { %p845_p10 = por %p844_p9, %p843_p8 }
  0x50   :  { %p846_p11 = pnand %p845_p10, %p839_p7 }
  0x52   :  { %849 = shalt.err (!%p846_p11)
}
  0x53   :  { %81 = dma.hbm_to_vmem [thread:$0]  %s1077_s7, 2048, %s76_s30, [#allocation9], %s881_s19, %s881_s19, %s882_s20  }
  0x54   :  { %872 = dma.done.wait [#allocation3], 128  }
  0x55   :  { %873 = vsyncadd [#allocation3], 4294967168 }
  0x56   :  { %874 = dma.done.wait [#allocation6], 2304  }
  0x57   :  { %875 = vsyncadd [#allocation6], 4294964992 }
  0x58   :  { %876 = dma.done.wait [#allocation9], 4096  }
  0x59   :  { %877 = vsyncadd [#allocation9], 4294963200  ;;  %v887_v0 = vmov 0.0|0.0   ;;  %vm888_vm0 = vmmov 0   ;;  %v889_v1 = vmov 0.0   ;;  %v100_v2 = vld [vmem:[#allocation5] sm:$0xff] }
  0x5a   :  { %654 = vmatprep.subr.bf16.mxu0 %v887_v0  ;;  %546 = vmatprep.mubr.msk.f32.mxu0 %vm888_vm0, %v889_v1  ;;  %v101_v3 = vld [vmem:[#allocation5 + $0x8] sm:$0xff]  ;;  %v184_v5 = vld [vmem:[#allocation7] sm:$0xff]  ;;  %v185_v6 = vld [vmem:[#allocation7 + $0x8] sm:$0xff]  ;;  %vm109_vm1 = vcmask 130048   ;;  %s890_s11 = smov [#allocation11]  }
  0x5b   :  { %657 = vmatprep.subr.bf16.mxu1 %v887_v0  ;;  %581 = vmatprep.mubr.msk.f32.mxu1 %vm888_vm0, %v889_v1  ;;  %v655_v4 = vpack.c.bf16 %v101_v3, %v100_v2  ;;  %v186_v7 = vld [vmem:[#allocation7 + $0x10] sm:$0xff]  ;;  %v658_v8 = vpack.c.bf16 %v185_v6, %v184_v5  ;;  %v187_v9 = vld [vmem:[#allocation7 + $0x18] sm:$0xff]  ;;  %v99_v10 = vld [vmem:[#allocation2] sm:$0xff]  ;;  %s472_s12 = sshll.u32 %s890_s11, 4  ;;  %s473_s12 = int_to_ptr.vmem [resolvable:$true] %s472_s12 }
  0x5c   :  { %v661_v11 = vpack.c.bf16 %v187_v9, %v186_v7  ;;  %v188_v12 = vld [vmem:[#allocation7 + $0x20] sm:$0xff]  ;;  %v189_v13 = vld [vmem:[#allocation7 + $0x28] sm:$0xff]  ;;  %v190_v15 = vld [vmem:[#allocation7 + $0x30] sm:$0xff]  ;;  %s850_s13 = scalar_lea.vmem %s473_s12, 128  ;;  %p855_p13 = scmp.lt.s32.totalorder %s473_s12, %s473_s12 }
  0x5d   :  { %656 = vmatpush3.bf16.msra.mxu0 %v655_v4  ;;  %659 = vmatpush3.bf16.msra.mxu1 %v658_v8  ;;  %v664_v14 = vpack.c.bf16 %v189_v13, %v188_v12  ;;  %v191_v16 = vld [vmem:[#allocation7 + $0x38] sm:$0xff]  ;;  %v192_v18 = vld [vmem:[#allocation7 + $0x40] sm:$0xff]  ;;  %v193_v19 = vld [vmem:[#allocation7 + $0x48] sm:$0xff]  ;;  %p851_p12 = scmp.ne.s32.totalorder %s473_s12, %s850_s13  ;;  %p856_p0 = scmp.lt.s32.totalorder %s850_s13, %s850_s13 }
  0x5e   :  { %681 = vmatprep.subr.bf16.mxu0 %v887_v0  ;;  %660 = vmatprep.subr.bf16.mxu1 %v887_v0  ;;  %v667_v17 = vpack.c.bf16 %v191_v16, %v190_v15  ;;  %v670_v20 = vpack.c.bf16 %v193_v19, %v192_v18  ;;  %v194_v21 = vld [vmem:[#allocation7 + $0x50] sm:$0xff]  ;;  %v195_v22 = vld [vmem:[#allocation7 + $0x58] sm:$0xff]  ;;  %v196_v24 = vld [vmem:[#allocation7 + $0x60] sm:$0xff] }
  0x5f   :  { %v673_v23 = vpack.c.bf16 %v195_v22, %v194_v21  ;;  %v197_v25 = vld [vmem:[#allocation7 + $0x68] sm:$0xff]  ;;  %v198_v27 = vld [vmem:[#allocation7 + $0x70] sm:$0xff]  ;;  %v199_v28 = vld [vmem:[#allocation7 + $0x78] sm:$0xff]  ;;  %p857_p1 = por %p856_p0, %p855_p13 }
  0x60   :  { %547 = vmatmul.mubr.msk.f32.vlgmr.msra.gmra.mrb[0].mxu0 %vm109_vm1, %v99_v10  ;;  %v676_v26 = vpack.c.bf16 %v197_v25, %v196_v24  ;;  %v679_v29 = vpack.c.bf16 %v199_v28, %v198_v27  ;;  %v278_v30 = vld [vmem:[#allocation8] sm:$0xff]  ;;  %v279_v31 = vld [vmem:[#allocation8 + $0x8] sm:$0xff]  ;;  %v280_v32 = vld [vmem:[#allocation8 + $0x10] sm:$0xff] }
  0x61   :  { %616 = vmatprep.mubr.msk.f32.mxu0 %vm888_vm0, %v889_v1  ;;  %662 = vmatpush3.bf16.msra.mxu1 %v661_v11  ;;  %v682_v33 = vpack.c.bf16 %v279_v31, %v278_v30  ;;  %v281_v34 = vld [vmem:[#allocation8 + $0x18] sm:$0xff]  ;;  %v282_v36 = vld [vmem:[#allocation8 + $0x20] sm:$0xff]  ;;  %v283_v37 = vld [vmem:[#allocation8 + $0x28] sm:$0xff]  ;;  %p858_p2 = pnand %p857_p1, %p851_p12 }
  0x62   :  { %663 = vmatprep.subr.bf16.mxu1 %v887_v0  ;;  %v685_v35 = vpack.c.bf16 %v281_v34, %v280_v32  ;;  %v688_v38 = vpack.c.bf16 %v283_v37, %v282_v36  ;;  %v284_v39 = vld [vmem:[#allocation8 + $0x30] sm:$0xff]  ;;  %v285_v40 = vld [vmem:[#allocation8 + $0x38] sm:$0xff]  ;;  %v286_v42 = vld [vmem:[#allocation8 + $0x40] sm:$0xff] }
  0x63   :  { %683 = vmatpush3.bf16.msra.mxu0 %v682_v33  ;;  %v691_v41 = vpack.c.bf16 %v285_v40, %v284_v39  ;;  %v287_v43 = vld [vmem:[#allocation8 + $0x48] sm:$0xff]  ;;  %v288_v45 = vld [vmem:[#allocation8 + $0x50] sm:$0xff]  ;;  %v289_v46 = vld [vmem:[#allocation8 + $0x58] sm:$0xff] }
  0x64   :  { %684 = vmatprep.subr.bf16.mxu0 %v887_v0  ;;  %v694_v44 = vpack.c.bf16 %v287_v43, %v286_v42  ;;  %v697_v47 = vpack.c.bf16 %v289_v46, %v288_v45  ;;  %v290_v48 = vld [vmem:[#allocation8 + $0x60] sm:$0xff]  ;;  %v291_v49 = vld [vmem:[#allocation8 + $0x68] sm:$0xff]  ;;  %v292_v56 = vld [vmem:[#allocation8 + $0x70] sm:$0xff] }
  0x65   :  { %665 = vmatpush3.bf16.msra.mxu1 %v664_v14  ;;  %v700_v50 = vpack.c.bf16 %v291_v49, %v290_v48  ;;  %v483_v51 = vld [vmem:[%s1072_s2] ss:$0 sm:$0xff]  ;;  %v293_v57 = vld [vmem:[#allocation8 + $0x78] sm:$0xff]  ;;  %v372_v59 = vld [vmem:[#allocation10] sm:$0xff] }
  0x66   :  { %666 = vmatprep.subr.bf16.mxu1 %v887_v0  ;;  %v703_v58 = vpack.c.bf16 %v293_v57, %v292_v56  ;;  %v373_v60 = vld [vmem:[#allocation10 + $0x8] sm:$0xff]  ;;  %v374_v61 = vld [vmem:[#allocation10 + $0x10] sm:$0xff]  ;;  %v375_v63 = vld [vmem:[#allocation10 + $0x18] sm:$0xff] }
  0x67   :  { %686 = vmatpush3.bf16.msra.mxu0 %v685_v35  ;;  %v706_v62 = vpack.c.bf16 %v373_v60, %v372_v59  ;;  %v709_v2 = vpack.c.bf16 %v375_v63, %v374_v61  ;;  %v376_v3 = vld [vmem:[#allocation10 + $0x20] sm:$0xff]  ;;  %v377_v4 = vld [vmem:[#allocation10 + $0x28] sm:$0xff]  ;;  %v379_v6 = vld [vmem:[#allocation10 + $0x38] sm:$0xff] }
  0x68   :  { %687 = vmatprep.subr.bf16.mxu0 %v887_v0  ;;  %v712_v5 = vpack.c.bf16 %v377_v4, %v376_v3  ;;  %v380_v8 = vld [vmem:[#allocation10 + $0x40] sm:$0xff]  ;;  %v381_v9 = vld [vmem:[#allocation10 + $0x48] sm:$0xff]  ;;  %v382_v11 = vld [vmem:[#allocation10 + $0x50] sm:$0xff] }
  0x69   :  { %668 = vmatpush3.bf16.msra.mxu1 %v667_v17  ;;  %v718_v10 = vpack.c.bf16 %v381_v9, %v380_v8  ;;  %v383_v12 = vld [vmem:[#allocation10 + $0x58] sm:$0xff]  ;;  %v384_v14 = vld [vmem:[#allocation10 + $0x60] sm:$0xff]  ;;  %v385_v15 = vld [vmem:[#allocation10 + $0x68] sm:$0xff] }
  0x6a   :  { %669 = vmatprep.subr.bf16.mxu1 %v887_v0  ;;  %v721_v13 = vpack.c.bf16 %v383_v12, %v382_v11  ;;  %v724_v16 = vpack.c.bf16 %v385_v15, %v384_v14  ;;  %v485_v17 = vld [vmem:[%s1074_s4] ss:$0 sm:$0xff]  ;;  %v386_v22 = vld [vmem:[#allocation10 + $0x70] sm:$0xff] }
  0x6b   :  { %689 = vmatpush3.bf16.msra.mxu0 %v688_v38  ;;  %v486_v25 = vld [vmem:[%s1076_s6] ss:$0 sm:$0xff] }
  0x6c   :  { %690 = vmatprep.subr.bf16.mxu0 %v887_v0 }
  0x6d   :  { %671 = vmatpush3.bf16.msra.mxu1 %v670_v20 }
  0x6e   :  { %672 = vmatprep.subr.bf16.mxu1 %v887_v0 }
  0x6f   :  { %692 = vmatpush3.bf16.msra.mxu0 %v691_v41 }
  0x70   :  { %693 = vmatprep.subr.bf16.mxu0 %v887_v0 }
  0x71   :  { %674 = vmatpush3.bf16.msra.mxu1 %v673_v23  ;;  %v387_v23 = vld [vmem:[#allocation10 + $0x78] sm:$0xff] }
  0x72   :  { %675 = vmatprep.subr.bf16.mxu1 %v887_v0  ;;  %v727_v24 = vpack.c.bf16 %v387_v23, %v386_v22 }
  0x73   :  { %695 = vmatpush3.bf16.msra.mxu0 %v694_v44 }
  0x74   :  { %696 = vmatprep.subr.bf16.mxu0 %v887_v0 }
  0x75   :  { %677 = vmatpush3.bf16.msra.mxu1 %v676_v26 }
  0x76   :  { %678 = vmatprep.subr.bf16.mxu1 %v887_v0 }
  0x77   :  { %698 = vmatpush3.bf16.msra.mxu0 %v697_v47 }
  0x78   :  { %699 = vmatprep.subr.bf16.mxu0 %v887_v0 }
  0x79   :  { %680 = vmatpush3.bf16.msra.mxu1 %v679_v29  ;;  %v487_v29 = vld [vmem:[%s1078_s8] ss:$0 sm:$0xff] }
  0x7a   :  { %705 = vmatprep.subr.bf16.mxu1 %v887_v0 }
  0x7b   :  { %701 = vmatpush3.bf16.msra.mxu0 %v700_v50 }
  0x7c   :  { %702 = vmatprep.subr.bf16.mxu0 %v887_v0 }
  0x7f   :  { %704 = vmatpush3.bf16.msra.mxu0 %v703_v58 }
 0x133   :  { %v179_v52 = vpop.f32.mrb[0].mxu0 }
 0x134   :  { %v180_v53 = vadd.f32 %v483_v51, %v179_v52  ;;  %v548_v54 = vpop.f32.mrb[1].mxu0 }
 0x136   :  { %v183_v55 = vmax.f32 %v180_v53, 0.0 }
 0x138   :  { %582 = vmatmul.mubr.f32.vlgmr.msra.gmra.mrb[0].mxu1 %v183_v55 }
 0x139   :  { %651 = vmatprep.mubr.msk.f32.mxu1 %vm888_vm0, %v889_v1  ;;  %707 = vmatpush3.bf16.msra.mxu1 %v706_v62  ;;  %v378_v1 = vld [vmem:[#allocation10 + $0x30] sm:$0xff] }
 0x13a   :  { %708 = vmatprep.subr.bf16.mxu1 %v887_v0  ;;  %v715_v7 = vpack.c.bf16 %v379_v6, %v378_v1 }
 0x13d   :  { %710 = vmatpush3.bf16.msra.mxu1 %v709_v2 }
 0x13e   :  { %711 = vmatprep.subr.bf16.mxu1 %v887_v0 }
 0x141   :  { %713 = vmatpush3.bf16.msra.mxu1 %v712_v5 }
 0x142   :  { %714 = vmatprep.subr.bf16.mxu1 %v887_v0 }
 0x145   :  { %716 = vmatpush3.bf16.msra.mxu1 %v715_v7 }
 0x146   :  { %717 = vmatprep.subr.bf16.mxu1 %v887_v0 }
 0x149   :  { %719 = vmatpush3.bf16.msra.mxu1 %v718_v10 }
 0x14a   :  { %720 = vmatprep.subr.bf16.mxu1 %v887_v0 }
 0x14d   :  { %722 = vmatpush3.bf16.msra.mxu1 %v721_v13 }
 0x14e   :  { %723 = vmatprep.subr.bf16.mxu1 %v887_v0 }
 0x151   :  { %725 = vmatpush3.bf16.msra.mxu1 %v724_v16 }
 0x152   :  { %726 = vmatprep.subr.bf16.mxu1 %v887_v0 }
 0x155   :  { %728 = vmatpush3.bf16.msra.mxu1 %v727_v24 }
 0x20b   :  { %v273_v18 = vpop.f32.mrb[0].mxu1 }
 0x20c   :  { %v274_v19 = vadd.f32 %v485_v17, %v273_v18  ;;  %v583_v20 = vpop.f32.mrb[1].mxu1 }
 0x20e   :  { %v277_v21 = vmax.f32 %v274_v19, 0.0 }
 0x210   :  { %617 = vmatmul.mubr.f32.vlgmr.msra.gmra.mrb[2].mxu0 %v277_v21 }
 0x2e3   :  { %v367_v26 = vpop.f32.mrb[2].mxu0 }
 0x2e4   :  { %v368_v27 = vadd.f32 %v486_v25, %v367_v26  ;;  %v618_v0 = vpop.f32.mrb[3].mxu0 }
 0x2e6   :  { %v371_v28 = vmax.f32 %v368_v27, 0.0 }
 0x2e8   :  { %652 = vmatmul.mubr.f32.vlgmr.msra.gmra.mrb[2].mxu1 %v371_v28 }
 0x3bb   :  { %v461_v30 = vpop.f32.mrb[2].mxu1 }
 0x3bc   :  { %v462_v31 = vadd.f32 %v487_v29, %v461_v30  ;;  %v653_v32 = vpop.f32.mrb[3].mxu1 }
 0x3be   :  { %465 = vst [vmem:[#allocation11] sm:$0xff] %v462_v31 }
 0x3bf   :  { %861 = shalt.err (!%p858_p2)
}
 0x3c0   :  { %s862_s10 = scalar_lea.hbm %s1079_s9, 128 }
 0x3c1   :  { %p863_p3 = scmp.ne.s32.totalorder %s1079_s9, %s862_s10  ;;  %p866_p4 = scmp.lt.u32.totalorder %s862_s10, %s1079_s9 }
 0x3c3   :  { %p868_p5 = pnand %p866_p4, %p863_p3 }
 0x3c5   :  { %871 = shalt.err (!%p868_p5)
}
 0x3c6   :  { %475 = dma.vmem_to_hbm [thread:$0]  %s473_s12, 128, %s1079_s9, [#allocation4]  }
 0x3c7   :  { %878 = dma.done.wait [#allocation4], 128  }
 0x3c8   :  { %879 = vsyncadd [#allocation4], 4294967168 }
 0x3c9   :  { %479 = vsyncpa [#allocation3], 1 }
 0x3ca   :  { %480 = vsyncpa [#allocation6], 1 }
 0x3cb   :  { %481 = vsyncpa [#allocation9], 1 }
 0x3cc   :  { %482 = vsyncpa [#allocation4], 1 }

</bundles_post_ra>
